<compile_context>
chip_gen: v6e
topology: v6e:2x2x1
jax: 0.10.0
libtpu: 0.0.40
codegen_flags: <defaults>
</compile_context>

<pallas_src>
import functools

import numpy as np
import jax
import jax.numpy as jnp
from jax import lax
from jax.experimental import pallas as pl
from jax.experimental.pallas import tpu as pltpu


# Static network geometry: Conv2d(3, 6, 3) -> ReLU -> Conv2d(6, 16, 3)
C_IN, C1, C2 = 3, 6, 16
KH = KW = 3
LANE = 128


def _round_up(x, m):
    return (x + m - 1) // m * m


# ----------------------------------------------------------------------------
# One-off host-side (numpy) weight relayout — no traced ops on the call path.
# ----------------------------------------------------------------------------
def _banded_weight_np(w_hwio, w_in, tap_width, n_pad):
    """Consolidated-over-kh banded conv weight.

    band[kh*tap_width + (j+kw)*cin + c, j*cout + co] = w[kh, kw, c, co]
    so that  LHS @ band , with LHS rows = concat_kh(act[i+kh, :tap_width]) along
    lanes, reproduces the valid stride-1 conv for activations laid out as
    (H, W*Cin) rows.  Output columns are zero-padded to n_pad lanes.
    """
    w = np.asarray(jax.device_get(w_hwio), np.float32)
    kh_, kw_, cin, cout = w.shape
    w_out = w_in - kw_ + 1
    band = np.zeros((kh_ * tap_width, n_pad), np.float32)
    for kh in range(kh_):
        for kw in range(kw_):
            for j in range(w_out):
                r0 = kh * tap_width + (j + kw) * cin
                band[r0:r0 + cin, j * cout:(j + 1) * cout] = w[kh, kw]
    return band


def _tiled_bias_np(b, w_out, n_pad):
    bias = np.asarray(jax.device_get(b), np.float32)
    out = np.zeros((1, n_pad), np.float32)
    out[0, :w_out * bias.shape[0]] = np.tile(bias, w_out)
    return out


def prepare_params(params, h, w):
    """Build banded, lane-padded weights/biases once (weights are static)."""
    del h  # only the width enters the banded layout
    w1, b1, w2, b2 = params
    wo1 = w - KW + 1
    wo2 = wo1 - KW + 1
    n1_pad = _round_up(wo1 * C1, LANE)          # 84  -> 128
    n2_pad = _round_up(wo2 * C2, LANE)          # 192 -> 256
    w1b = jnp.asarray(_banded_weight_np(w1, w, w * C_IN, n1_pad))     # (144, 128)
    b1r = jnp.asarray(_tiled_bias_np(b1, wo1, n1_pad))                # (1, 128)
    w2b = jnp.asarray(_banded_weight_np(w2, wo1, n1_pad, n2_pad))     # (384, 256)
    b2r = jnp.asarray(_tiled_bias_np(b2, wo2, n2_pad))                # (1, 256)
    return w1b, b1r, w2b, b2r


# ----------------------------------------------------------------------------
# Fused kernel: conv1 -> ReLU -> conv2, one MXU matmul per conv.
# ----------------------------------------------------------------------------
def _fused_kernel(x_ref, w1_ref, b1_ref, w2_ref, b2_ref, o_ref, *, bsz, h1, h2):
    """x_ref : (bsz, H, W*Cin)      o_ref : (bsz, Ho2, 256)   (lane-dense).

    The (bsz*Ho1, 128) intermediate stays on-chip; only sublane slices and
    lane concatenations are used to form the consolidated LHS per conv.
    """
    # conv1 LHS: per batch element, concat the KH sublane-shifted slices on lanes.
    lhs1_rows = []
    for bi in range(bsz):
        xb = x_ref[bi]                                         # (H, W*Cin)
        lhs1_rows.append(
            jnp.concatenate([xb[kh:kh + h1, :] for kh in range(KH)], axis=1))
    lhs1 = lhs1_rows[0] if bsz == 1 else jnp.concatenate(lhs1_rows, axis=0)

    acc1 = jnp.dot(lhs1, w1_ref[...], preferred_element_type=jnp.float32)
    hact = jnp.maximum(acc1 + b1_ref[...], 0.0)                # (bsz*h1, 128)

    # conv2 LHS from the on-chip, lane-dense intermediate.
    lhs2_rows = []
    for bi in range(bsz):
        lhs2_rows.append(
            jnp.concatenate([hact[bi * h1 + kh:bi * h1 + kh + h2, :]
                             for kh in range(KH)], axis=1))
    lhs2 = lhs2_rows[0] if bsz == 1 else jnp.concatenate(lhs2_rows, axis=0)

    acc2 = jnp.dot(lhs2, w2_ref[...], preferred_element_type=jnp.float32)
    out = (acc2 + b2_ref[...]).astype(o_ref.dtype)             # (bsz*h2, 256)

    for bi in range(bsz):
        o_ref[bi] = out[bi * h2:(bi + 1) * h2, :]


# ----------------------------------------------------------------------------
# Wrapper (jitted so the NCHW<->slab layout plumbing fuses with neighbors).
# ----------------------------------------------------------------------------
@jax.jit
def _bar_forward_impl(x_nchw, w1b, b1r, w2b, b2r):
    n, cin, h, w = x_nchw.shape
    ho1, wo1 = h - KH + 1, w - KW + 1
    ho2, wo2 = ho1 - KH + 1, wo1 - KW + 1
    n2_pad = w2b.shape[1]

    # NCHW -> (N, H, W*Cin) lane slab.
    x2d = jnp.transpose(x_nchw, (0, 2, 3, 1)).reshape(n, h, w * cin)

    # Keep the grid at length 2 whenever possible (both v7x TCs busy); fold any
    # larger batch into the per-step block to amortize per-step overhead.
    num_blocks = 2 if n >= 2 else 1
    bsz = -(-n // num_blocks)
    n_pad = num_blocks * bsz
    if n_pad != n:
        x2d = jnp.pad(x2d, ((0, n_pad - n), (0, 0), (0, 0)))

    kernel = functools.partial(_fused_kernel, bsz=bsz, h1=ho1, h2=ho2)
    y = pl.pallas_call(
        kernel,
        out_shape=jax.ShapeDtypeStruct((n_pad, ho2, n2_pad), x_nchw.dtype),
        grid=(num_blocks,),
        in_specs=[
            pl.BlockSpec((bsz, h, w * cin), lambda i: (i, 0, 0)),
            pl.BlockSpec(w1b.shape, lambda i: (0, 0)),
            pl.BlockSpec(b1r.shape, lambda i: (0, 0)),
            pl.BlockSpec(w2b.shape, lambda i: (0, 0)),
            pl.BlockSpec(b2r.shape, lambda i: (0, 0)),
        ],
        out_specs=pl.BlockSpec((bsz, ho2, n2_pad), lambda i: (i, 0, 0)),
        compiler_params=pltpu.CompilerParams(
            dimension_semantics=("parallel",)),
    )(x2d, w1b, b1r, w2b, b2r)

    # Lane-dense (N, Ho2, 256) slab -> strip lane pad -> NCHW.
    y = y[:n, :, :wo2 * C2].reshape(n, ho2, wo2, C2)
    return jnp.transpose(y, (0, 3, 1, 2))


def bar_forward(x_nchw, prepared):
    """Bar.forward == Foo.forward: conv1 -> relu -> conv2. NCHW in / NCHW out."""
    return _bar_forward_impl(x_nchw, *prepared)


# ----------------------------------------------------------------------------
# Reference + init.
# ----------------------------------------------------------------------------
def _reference_forward(x_nchw, params):
    """Pure-JAX reference (lax conv) for correctness checking."""
    w1, b1, w2, b2 = params
    dn = ('NHWC', 'HWIO', 'NHWC')
    x = jnp.transpose(x_nchw, (0, 2, 3, 1))
    x = lax.conv_general_dilated(x, w1, (1, 1), 'VALID', dimension_numbers=dn)
    x = jnp.maximum(x + b1.reshape(1, 1, 1, -1), 0.0)
    y = lax.conv_general_dilated(x, w2, (1, 1), 'VALID', dimension_numbers=dn)
    y = y + b2.reshape(1, 1, 1, -1)
    return jnp.transpose(y, (0, 3, 1, 2))


def init_params(key):
    """Deterministic init matching Conv2d(3,6,3) / Conv2d(6,16,3) shapes (HWIO)."""
    k1, k2, k3, k4 = jax.random.split(key, 4)
    w1 = jax.random.normal(k1, (3, 3, C_IN, C1), jnp.float32) * 0.1
    b1 = jax.random.normal(k2, (C1,), jnp.float32) * 0.1
    w2 = jax.random.normal(k3, (3, 3, C1, C2), jnp.float32) * 0.1
    b2 = jax.random.normal(k4, (C2,), jnp.float32) * 0.1
    return w1, b1, w2, b2


if __name__ == "__main__":
    key = jax.random.PRNGKey(0)
    k_x, k_p = jax.random.split(key)

    # Input consistent with Conv2d(3, ...): batch=2, channels=3, spatial=16 (NCHW).
    x = jax.random.normal(k_x, (2, 3, 16, 16), jnp.float32)
    params = init_params(k_p)

    # One-off host-side weight relayout (outside the per-call path).
    prepared = prepare_params(params, h=16, w=16)

    y = jax.block_until_ready(bar_forward(x, prepared))
    assert y.shape == (2, 16, 12, 12), y.shape

    y_ref = jax.block_until_ready(_reference_forward(x, params))
    assert jnp.allclose(y, y_ref, rtol=1e-4, atol=1e-4), \
        float(jnp.max(jnp.abs(y - y_ref)))

    print("KERNEL_OK")
</pallas_src>

<mosaic_0001>
module attributes {stable_mosaic.version = 11 : i64} {
  func.func @_fused_kernel(%arg0: i32, %arg1: memref<1x16x48xf32, #tpu.memory_space<vmem>>, %arg2: memref<144x128xf32, #tpu.memory_space<vmem>>, %arg3: memref<1x128xf32, #tpu.memory_space<vmem>>, %arg4: memref<384x256xf32, #tpu.memory_space<vmem>>, %arg5: memref<1x256xf32, #tpu.memory_space<vmem>>, %arg6: memref<1x12x256xf32, #tpu.memory_space<vmem>>) attributes {dimension_semantics = [#tpu.dimension_semantics<parallel>], iteration_bounds = array<i64: 2>, scalar_prefetch = 0 : i64, scratch_operands = 0 : i64, tpu.core_type = #tpu.core_type<tc>, window_params = [{transform_indices = @transform_0, window_bounds = array<i64: 1, 16, 48>}, {pipeline_mode = #tpu.pipeline_mode<synchronous>, transform_indices = @transform_1, window_bounds = array<i64: 144, 128>}, {pipeline_mode = #tpu.pipeline_mode<synchronous>, transform_indices = @transform_2, window_bounds = array<i64: 1, 128>}, {pipeline_mode = #tpu.pipeline_mode<synchronous>, transform_indices = @transform_3, window_bounds = array<i64: 384, 256>}, {pipeline_mode = #tpu.pipeline_mode<synchronous>, transform_indices = @transform_4, window_bounds = array<i64: 1, 256>}, {transform_indices = @transform_5, window_bounds = array<i64: 1, 12, 256>}]} {
    %c0 = arith.constant 0 : index
    %c0_0 = arith.constant 0 : index
    %c0_1 = arith.constant 0 : index
    %0 = vector.load %arg1[%c0, %c0_0, %c0_1] : memref<1x16x48xf32, #tpu.memory_space<vmem>>, vector<1x16x48xf32>
    %1 = vector.shape_cast %0 : vector<1x16x48xf32> to vector<16x48xf32>
    %2 = vector.extract_strided_slice %1 {offsets = [0, 0], sizes = [14, 48], strides = [1, 1]} : vector<16x48xf32> to vector<14x48xf32>
    %3 = vector.extract_strided_slice %1 {offsets = [1, 0], sizes = [14, 48], strides = [1, 1]} : vector<16x48xf32> to vector<14x48xf32>
    %4 = vector.extract_strided_slice %1 {offsets = [2, 0], sizes = [14, 48], strides = [1, 1]} : vector<16x48xf32> to vector<14x48xf32>
    %5 = tpu.concatenate %2, %3, %4 in 1 : vector<14x48xf32>, vector<14x48xf32>, vector<14x48xf32> -> vector<14x144xf32>
    %c0_2 = arith.constant 0 : index
    %c0_3 = arith.constant 0 : index
    %6 = vector.load %arg2[%c0_2, %c0_3] : memref<144x128xf32, #tpu.memory_space<vmem>>, vector<144x128xf32>
    %cst = arith.constant dense<0.000000e+00> : vector<14x128xf32>
    %7 = tpu.matmul %5, %6, %cst {dimension_numbers = #tpu.dot_dimension_numbers<[1], [0], [0], [1], [0, 0, 1, 1], [], []>} : vector<14x144xf32>, vector<144x128xf32>, vector<14x128xf32> -> vector<14x128xf32>
    %c0_4 = arith.constant 0 : index
    %c0_5 = arith.constant 0 : index
    %8 = vector.load %arg3[%c0_4, %c0_5] : memref<1x128xf32, #tpu.memory_space<vmem>>, vector<1x128xf32>
    %9 = vector.broadcast %8 : vector<1x128xf32> to vector<14x128xf32>
    %10 = arith.addf %7, %9 : vector<14x128xf32>
    %cst_6 = arith.constant 0.000000e+00 : f32
    %11 = vector.broadcast %cst_6 : f32 to vector<14x128xf32>
    %12 = arith.maximumf %10, %11 : vector<14x128xf32>
    %13 = vector.extract_strided_slice %12 {offsets = [0, 0], sizes = [12, 128], strides = [1, 1]} : vector<14x128xf32> to vector<12x128xf32>
    %14 = vector.extract_strided_slice %12 {offsets = [1, 0], sizes = [12, 128], strides = [1, 1]} : vector<14x128xf32> to vector<12x128xf32>
    %15 = vector.extract_strided_slice %12 {offsets = [2, 0], sizes = [12, 128], strides = [1, 1]} : vector<14x128xf32> to vector<12x128xf32>
    %16 = tpu.concatenate %13, %14, %15 in 1 : vector<12x128xf32>, vector<12x128xf32>, vector<12x128xf32> -> vector<12x384xf32>
    %c0_7 = arith.constant 0 : index
    %c0_8 = arith.constant 0 : index
    %17 = vector.load %arg4[%c0_7, %c0_8] : memref<384x256xf32, #tpu.memory_space<vmem>>, vector<384x256xf32>
    %cst_9 = arith.constant dense<0.000000e+00> : vector<12x256xf32>
    %18 = tpu.matmul %16, %17, %cst_9 {dimension_numbers = #tpu.dot_dimension_numbers<[1], [0], [0], [1], [0, 0, 1, 1], [], []>} : vector<12x384xf32>, vector<384x256xf32>, vector<12x256xf32> -> vector<12x256xf32>
    %c0_10 = arith.constant 0 : index
    %c0_11 = arith.constant 0 : index
    %19 = vector.load %arg5[%c0_10, %c0_11] : memref<1x256xf32, #tpu.memory_space<vmem>>, vector<1x256xf32>
    %20 = vector.broadcast %19 : vector<1x256xf32> to vector<12x256xf32>
    %21 = arith.addf %18, %20 : vector<12x256xf32>
    %c0_12 = arith.constant 0 : index
    %c0_13 = arith.constant 0 : index
    %c0_14 = arith.constant 0 : index
    %22 = vector.load %arg6[%c0_12, %c0_13, %c0_14] : memref<1x12x256xf32, #tpu.memory_space<vmem>>, vector<1x12x256xf32>
    %23 = vector.shape_cast %22 : vector<1x12x256xf32> to vector<12x256xf32>
    %24 = vector.shape_cast %21 : vector<12x256xf32> to vector<1x12x256xf32>
    tpu.vector_store %arg6[%c0_12, %c0_13, %c0_14], %24 {strides = array<i32>} : memref<1x12x256xf32, #tpu.memory_space<vmem>>, vector<1x12x256xf32>,
    return
  }
  func.func @transform_0(%arg0: i32) -> (i32, i32, i32) {
    %c0_i32 = arith.constant 0 : i32
    %c0_i32_0 = arith.constant 0 : i32
    %c0_i32_1 = arith.constant 0 : i32
    return %arg0, %c0_i32, %c0_i32_0 : i32, i32, i32
  }
  func.func @transform_1(%arg0: i32) -> (i32, i32) {
    %c0_i32 = arith.constant 0 : i32
    %c0_i32_0 = arith.constant 0 : i32
    %c0_i32_1 = arith.constant 0 : i32
    return %c0_i32, %c0_i32_0 : i32, i32
  }
  func.func @transform_2(%arg0: i32) -> (i32, i32) {
    %c0_i32 = arith.constant 0 : i32
    %c0_i32_0 = arith.constant 0 : i32
    %c0_i32_1 = arith.constant 0 : i32
    return %c0_i32, %c0_i32_0 : i32, i32
  }
  func.func @transform_3(%arg0: i32) -> (i32, i32) {
    %c0_i32 = arith.constant 0 : i32
    %c0_i32_0 = arith.constant 0 : i32
    %c0_i32_1 = arith.constant 0 : i32
    return %c0_i32, %c0_i32_0 : i32, i32
  }
  func.func @transform_4(%arg0: i32) -> (i32, i32) {
    %c0_i32 = arith.constant 0 : i32
    %c0_i32_0 = arith.constant 0 : i32
    %c0_i32_1 = arith.constant 0 : i32
    return %c0_i32, %c0_i32_0 : i32, i32
  }
  func.func @transform_5(%arg0: i32) -> (i32, i32, i32) {
    %c0_i32 = arith.constant 0 : i32
    %c0_i32_0 = arith.constant 0 : i32
    %c0_i32_1 = arith.constant 0 : i32
    return %arg0, %c0_i32, %c0_i32_0 : i32, i32, i32
  }
}

</mosaic_0001>

<bundles_post_ra>
// kernel: _bar_forward_impl.1
= control target key start
LH: loop header
LB: loop body
LE: loop exit
PB: predicated region body
PF: predicated region fallthrough
CT: control target
= control target key end

     0   :  { %10 = vsyncpa [#allocation3], 0  ;;  %s838_s18 = smov 0   ;;  %s969_s0 = inlined_call_operand.vmem [shape: f32[2,16,48], index: 0, kind: input, shape index: {}]   ;;  %s970_s1 = inlined_call_operand.vmem [shape: f32[144,128], index: 1, kind: input, shape index: {}]   ;;  %s971_s2 = inlined_call_operand.vmem [shape: f32[1,128], index: 2, kind: input, shape index: {}]   ;;  %s972_s3 = inlined_call_operand.hbm [shape: f32[384,256], index: 3, kind: input, shape index: {}]   ;;  %s973_s4 = inlined_call_operand.vmem [shape: f32[1,256], index: 4, kind: input, shape index: {}]   ;;  %s974_s5 = inlined_call_operand.vmem [shape: f32[2,12,256], index: 5, kind: output, shape index: {}]  }
   0x1 LB: > { %s722_s19 = sadd.s32 4294967295, %s800_s18   ;;  %p724_p0 = scmp.ge.s32.totalorder %s800_s18, 1  ;;  %s800_s18 = sphi %s838_s18, %s16_s18  }
   0x2   : > { %p157_p1 = scmp.lt.s32.totalorder %s800_s18, 3  ;;  %s802_s20 = smov [#allocation2]  }
   0x3   : > { %s175_s21 = sshll.u32 %s802_s20, 4  ;;  %p748_p3 = scmp.eq.s32.totalorder %s722_s19, 0  ;;  %s176_s21 = int_to_ptr.vmem [resolvable:$true] %s175_s21 }
   0x4   : > { %p846_p2 = pnand %p724_p0, %p157_p1  ;;  %s775_s23 = scalar_lea.vmem %s176_s21, 12288 }
   0x5   : > { %p776_p7 = scmp.ne.s32.totalorder %s176_s21, %s775_s23  ;;  %p783_p10 = scmp.lt.s32.totalorder %s176_s21, %s176_s21 }
   0x6   : > { %p744_p4 = pneg %p846_p2  ;;  %p784_p11 = scmp.lt.s32.totalorder %s775_s23, %s775_s23 }
   0x8   : > { %p745_p5 = pnand %p748_p3, %p744_p4  ;;  %p785_p12 = por %p784_p11, %p783_p10 }
   0xa   : > { %p766_p6 = pneg %p745_p5 }
   0xc   : > { %p778_p8 = pnand %p776_p7, %p766_p6 }
   0xe   : > { %p779_p9 = pneg %p778_p8 }
  0x10   : > { %p786_p13 = pnand %p785_p12, %p779_p9 }
  0x12   : > { %789 = shalt.err (!%p786_p13)
}
  0x13   : > { %s803_s24 = smov 256   ;;  %s804_s25 = smov 16  }
  0x14   : > { %747 = dma.hbm_to_vmem [thread:$0]  (!%p745_p5), %s972_s3, 12288, %s176_s21, [#allocation3], %s803_s24, %s803_s24, %s804_s25  }
  0x15   : > { %202 = sbr.rel (%p846_p2) target bundleno = 565 (0x235), region = 40 }
  0x1a   : > { %795 = dma.done.wait (%p748_p3), [#allocation3], 12288  }
  0x1b   : > { %797 = vsyncadd (%p748_p3), [#allocation3], 4294955008  ;;  %p230_p0 = scmp.lt.s32.totalorder %s722_s19, 1  ;;  %v805_v0 = vmov 0.0   ;;  %vm244_vm0 = vcmask 1046528   ;;  %v285_v3 = vld [vmem:[%s970_s1 + $0x78] sm:$0xff] }
  0x1c   : > { %300 = vmatprep.subr.mxu0 %v805_v0  ;;  %v284_v8 = vld [vmem:[%s970_s1 + $0x70] sm:$0xff]  ;;  %vm254_vm1 = vcmask 1045504   ;;  %v283_v9 = vld [vmem:[%s970_s1 + $0x68] sm:$0xff]  ;;  %s806_s13 = smov 48   ;;  %v282_v11 = vld [vmem:[%s970_s1 + $0x60] sm:$0xff]  ;;  %s807_s20 = smov 96  }
  0x1d   : > { %s977_s19 = smov (!%p230_p0, %s722_s19), 1  ;;  %301 = vmatpush1.msra.mxu0 %v285_v3  ;;  %v281_v13 = vld [vmem:[%s970_s1 + $0x58] sm:$0xff]  ;;  %v419_v15 = vld [vmem:[#allocation2 + $0xf0] sm:$0xff]  ;;  %v418_v17 = vld [vmem:[#allocation2 + $0xe8] sm:$0xff]  ;;  %vm264_vm2 = vcmask 392192   ;;  %vm295_vm3 = vcmask 130048  }
  0x1e   : > { %s738_s28 = sshll.u32 %s977_s19, 4  ;;  %302 = vmatprep.subr.mxu0 %v805_v0  ;;  %v420_v14 = vld [vmem:[#allocation2 + $0xf8] sm:$0xff]  ;;  %v280_v16 = vld [vmem:[%s970_s1 + $0x50] sm:$0xff]  ;;  %v417_v18 = vld [vmem:[#allocation2 + $0xe0] sm:$0xff]  ;;  %vm267_vm4 = vcmask 785408  }
  0x1f   : > { %s234_s6 = scalar_lea.vmem %s969_s0, %s738_s28  ;;  %303 = vmatpush1.msra.mxu0 %v284_v8  ;;  %497 = vmatprep.subr.mxu1 %v420_v14  ;;  %v279_v19 = vld [vmem:[%s970_s1 + $0x48] sm:$0xff]  ;;  %v416_v20 = vld [vmem:[#allocation2 + $0xd8] sm:$0xff]  ;;  %v415_v21 = vld [vmem:[#allocation2 + $0xd0] sm:$0xff]  ;;  %s739_s28 = sshll.u32 %s977_s19, 5 }
  0x20   : > { %v867_v1 = vld [vmem:[%s234_s6] sm:$0xff]  ;;  %v869_v2 = vld [vmem:[%s234_s6 + $0x8] sm:$0xff]  ;;  %304 = vmatprep.subr.mxu0 %v805_v0  ;;  %498 = vmatpush1.msra.mxu1 %v419_v15  ;;  %v277_v25 = vld [vmem:[%s970_s1 + $0x38] sm:$0xff]  ;;  %s239_s6 = scalar_lea.vmem %s974_s5, %s739_s28 }
  0x21   : > { %v245_v4 = vrot.slane %v867_v1, 1  ;;  %v246_v5 = vrot.slane %v869_v2, 1  ;;  %v255_v6 = vrot.slane %v867_v1, 2  ;;  %v256_v7 = vrot.slane %v869_v2, 2  ;;  %305 = vmatpush1.msra.mxu0 %v283_v9  ;;  %499 = vmatprep.subr.mxu1 %v418_v17  ;;  %v278_v22 = vld [vmem:[%s970_s1 + $0x40] sm:$0xff]  ;;  %v414_v23 = vld [vmem:[#allocation2 + $0xc8] sm:$0xff] }
  0x22   : > { %306 = vmatprep.subr.mxu0 %v805_v0  ;;  %500 = vmatpush1.msra.mxu1 %v417_v18  ;;  %v413_v24 = vld [vmem:[#allocation2 + $0xc0] sm:$0xff]  ;;  %v412_v26 = vld [vmem:[#allocation2 + $0xb8] sm:$0xff]  ;;  %v411_v27 = vld [vmem:[#allocation2 + $0xb0] sm:$0xff] }
  0x23   : > { %v247_v10 = vsel %vm244_vm0, %v245_v4, %v246_v5  ;;  %250 = vrot.lane.b32.xlu1 %v246_v5, %s806_s13  ;;  %v257_v12 = vsel %vm254_vm1, %v255_v6, %v256_v7  ;;  %307 = vmatpush1.msra.mxu0 %v282_v11  ;;  %v276_v28 = vld [vmem:[%s970_s1 + $0x30] sm:$0xff]  ;;  %v410_v29 = vld [vmem:[#allocation2 + $0xa8] sm:$0xff]  ;;  %v409_v30 = vld [vmem:[#allocation2 + $0xa0] sm:$0xff] }
  0x24   : > { %248 = vrot.lane.b32.xlu0 %v247_v10, %s806_s13  ;;  %308 = vmatprep.subr.mxu0 %v805_v0  ;;  %v275_v31 = vld [vmem:[%s970_s1 + $0x28] sm:$0xff]  ;;  %v408_v32 = vld [vmem:[#allocation2 + $0x98] sm:$0xff]  ;;  %v407_v33 = vld [vmem:[#allocation2 + $0x90] sm:$0xff] }
  0x25   : > { %309 = vmatpush1.msra.mxu0 %v281_v13  ;;  %501 = vmatprep.subr.mxu1 %v416_v20  ;;  %v274_v34 = vld [vmem:[%s970_s1 + $0x20] sm:$0xff]  ;;  %v406_v35 = vld [vmem:[#allocation2 + $0x88] sm:$0xff]  ;;  %v273_v37 = vld [vmem:[%s970_s1 + $0x18] sm:$0xff] }
  0x26   : > { %310 = vmatprep.subr.mxu0 %v805_v0  ;;  %502 = vmatpush1.msra.mxu1 %v415_v21  ;;  %v405_v36 = vld [vmem:[#allocation2 + $0x80] sm:$0xff]  ;;  %v404_v38 = vld [vmem:[#allocation2 + $0x78] sm:$0xff]  ;;  %v403_v39 = vld [vmem:[#allocation2 + $0x70] sm:$0xff] }
  0x27   : > { %260 = vrot.lane.b32.xlu1 %v256_v7, %s807_s20  ;;  %311 = vmatpush1.msra.mxu0 %v280_v16  ;;  %v272_v40 = vld [vmem:[%s970_s1 + $0x10] sm:$0xff]  ;;  %v402_v41 = vld [vmem:[#allocation2 + $0x68] sm:$0xff]  ;;  %v401_v42 = vld [vmem:[#allocation2 + $0x60] sm:$0xff] }
  0x28   : > { %258 = vrot.lane.b32.xlu0 %v257_v12, %s807_s20  ;;  %312 = vmatprep.subr.mxu0 %v805_v0  ;;  %v271_v43 = vld [vmem:[%s970_s1 + $0x8] sm:$0xff]  ;;  %v400_v44 = vld [vmem:[#allocation2 + $0x58] sm:$0xff]  ;;  %v399_v45 = vld [vmem:[#allocation2 + $0x50] sm:$0xff] }
  0x29   : > { %313 = vmatpush1.msra.mxu0 %v279_v19  ;;  %503 = vmatprep.subr.mxu1 %v414_v23  ;;  %v270_v46 = vld [vmem:[%s970_s1] sm:$0xff]  ;;  %v398_v47 = vld [vmem:[#allocation2 + $0x48] sm:$0xff]  ;;  %v396_v50 = vld [vmem:[#allocation2 + $0x38] sm:$0xff] }
  0x2a   : > { %314 = vmatprep.subr.mxu0 %v805_v0  ;;  %504 = vmatpush1.msra.mxu1 %v413_v24  ;;  %v397_v48 = vld [vmem:[#allocation2 + $0x40] sm:$0xff]  ;;  %v287_v49 = vld [vmem:[%s970_s1 + $0x88] sm:$0xff]  ;;  %v395_v51 = vld [vmem:[#allocation2 + $0x30] sm:$0xff] }
  0x2b   : > { %315 = vmatpush1.msra.mxu0 %v278_v22  ;;  %505 = vmatprep.subr.mxu1 %v412_v26  ;;  %v286_v52 = vld [vmem:[%s970_s1 + $0x80] sm:$0xff]  ;;  %v394_v53 = vld [vmem:[#allocation2 + $0x28] sm:$0xff]  ;;  %v484_v55 = vld [vmem:[#allocation2 + $0x2f8] sm:$0xff] }
  0x2c   : > { %316 = vmatprep.subr.mxu0 %v805_v0  ;;  %506 = vmatpush1.msra.mxu1 %v411_v27  ;;  %v393_v54 = vld [vmem:[#allocation2 + $0x20] sm:$0xff]  ;;  %v392_v56 = vld [vmem:[#allocation2 + $0x18] sm:$0xff]  ;;  %v391_v57 = vld [vmem:[#allocation2 + $0x10] sm:$0xff] }
  0x2d   : > { %317 = vmatpush1.msra.mxu0 %v277_v25  ;;  %507 = vmatprep.subr.mxu1 %v410_v29  ;;  %v390_v58 = vld [vmem:[#allocation2 + $0x8] sm:$0xff]  ;;  %v389_v59 = vld [vmem:[#allocation2] sm:$0xff]  ;;  %v452_v60 = vld [vmem:[#allocation2 + $0x1f8] sm:$0xff] }
  0x2e   : > { %318 = vmatprep.subr.mxu0 %v805_v0  ;;  %508 = vmatpush1.msra.mxu1 %v409_v30  ;;  %v451_v61 = vld [vmem:[#allocation2 + $0x1f0] sm:$0xff]  ;;  %v450_v62 = vld [vmem:[#allocation2 + $0x1e8] sm:$0xff]  ;;  %v449_v63 = vld [vmem:[#allocation2 + $0x1e0] sm:$0xff] }
  0x2f   : > { %319 = vmatpush1.msra.mxu0 %v276_v28  ;;  %509 = vmatprep.subr.mxu1 %v408_v32  ;;  %v448_v3 = vld [vmem:[#allocation2 + $0x1d8] sm:$0xff]  ;;  %v447_v4 = vld [vmem:[#allocation2 + $0x1d0] sm:$0xff]  ;;  %v446_v5 = vld [vmem:[#allocation2 + $0x1c8] sm:$0xff] }
  0x30   : > { %320 = vmatprep.subr.mxu0 %v805_v0  ;;  %510 = vmatpush1.msra.mxu1 %v407_v33  ;;  %v445_v6 = vld [vmem:[#allocation2 + $0x1c0] sm:$0xff]  ;;  %v444_v7 = vld [vmem:[#allocation2 + $0x1b8] sm:$0xff]  ;;  %v443_v8 = vld [vmem:[#allocation2 + $0x1b0] sm:$0xff] }
  0x31   : > { %321 = vmatpush1.msra.mxu0 %v275_v31  ;;  %511 = vmatprep.subr.mxu1 %v406_v35  ;;  %v442_v9 = vld [vmem:[#allocation2 + $0x1a8] sm:$0xff]  ;;  %v441_v10 = vld [vmem:[#allocation2 + $0x1a0] sm:$0xff]  ;;  %v440_v11 = vld [vmem:[#allocation2 + $0x198] sm:$0xff] }
  0x32   : > { %322 = vmatprep.subr.mxu0 %v805_v0  ;;  %512 = vmatpush1.msra.mxu1 %v405_v36  ;;  %v439_v12 = vld [vmem:[#allocation2 + $0x190] sm:$0xff]  ;;  %v438_v13 = vld [vmem:[#allocation2 + $0x188] sm:$0xff]  ;;  %v437_v14 = vld [vmem:[#allocation2 + $0x180] sm:$0xff] }
  0x33   : > { %323 = vmatpush1.msra.mxu0 %v274_v34  ;;  %513 = vmatprep.subr.mxu1 %v404_v38  ;;  %v436_v15 = vld [vmem:[#allocation2 + $0x178] sm:$0xff]  ;;  %v435_v16 = vld [vmem:[#allocation2 + $0x170] sm:$0xff]  ;;  %v434_v17 = vld [vmem:[#allocation2 + $0x168] sm:$0xff] }
  0x34   : > { %324 = vmatprep.subr.mxu0 %v805_v0  ;;  %514 = vmatpush1.msra.mxu1 %v403_v39  ;;  %v483_v22 = vld [vmem:[#allocation2 + $0x2f0] sm:$0xff]  ;;  %v482_v24 = vld [vmem:[#allocation2 + $0x2e8] sm:$0xff]  ;;  %v481_v27 = vld [vmem:[#allocation2 + $0x2e0] sm:$0xff] }
  0x35   : > { %325 = vmatpush1.msra.mxu0 %v273_v37  ;;  %515 = vmatprep.subr.mxu1 %v402_v41  ;;  %v480_v28 = vld [vmem:[#allocation2 + $0x2d8] sm:$0xff]  ;;  %v479_v29 = vld [vmem:[#allocation2 + $0x2d0] sm:$0xff]  ;;  %v477_v31 = vld [vmem:[#allocation2 + $0x2c0] sm:$0xff] }
  0x36   : > { %326 = vmatprep.subr.mxu0 %v805_v0  ;;  %516 = vmatpush1.msra.mxu1 %v401_v42  ;;  %v476_v32 = vld [vmem:[#allocation2 + $0x2b8] sm:$0xff]  ;;  %v474_v33 = vld [vmem:[#allocation2 + $0x2a8] sm:$0xff]  ;;  %v473_v34 = vld [vmem:[#allocation2 + $0x2a0] sm:$0xff] }
  0x37   : > { %327 = vmatpush1.msra.mxu0 %v272_v40  ;;  %517 = vmatprep.subr.mxu1 %v400_v44  ;;  %v472_v35 = vld [vmem:[#allocation2 + $0x298] sm:$0xff]  ;;  %v471_v36 = vld [vmem:[#allocation2 + $0x290] sm:$0xff]  ;;  %v470_v37 = vld [vmem:[#allocation2 + $0x288] sm:$0xff] }
  0x38   : > { %328 = vmatprep.subr.mxu0 %v805_v0  ;;  %518 = vmatpush1.msra.mxu1 %v399_v45  ;;  %v469_v38 = vld [vmem:[#allocation2 + $0x280] sm:$0xff]  ;;  %v468_v39 = vld [vmem:[#allocation2 + $0x278] sm:$0xff]  ;;  %v467_v40 = vld [vmem:[#allocation2 + $0x270] sm:$0xff] }
  0x39   : > { %329 = vmatpush1.msra.mxu0 %v271_v43  ;;  %519 = vmatprep.subr.mxu1 %v398_v47  ;;  %v466_v41 = vld [vmem:[#allocation2 + $0x268] sm:$0xff]  ;;  %v465_v42 = vld [vmem:[#allocation2 + $0x260] sm:$0xff]  ;;  %v464_v44 = vld [vmem:[#allocation2 + $0x258] sm:$0xff] }
  0x3a   : > { %330 = vmatprep.subr.mxu0 %v805_v0  ;;  %520 = vmatpush1.msra.mxu1 %v397_v48  ;;  %v433_v43 = vld [vmem:[#allocation2 + $0x160] sm:$0xff]  ;;  %v432_v45 = vld [vmem:[#allocation2 + $0x158] sm:$0xff]  ;;  %v431_v47 = vld [vmem:[#allocation2 + $0x150] sm:$0xff] }
  0x3b   : > { %331 = vmatpush1.msra.mxu0 %v270_v46  ;;  %521 = vmatprep.subr.mxu1 %v396_v50  ;;  %v463_v46 = vld [vmem:[#allocation2 + $0x250] sm:$0xff]  ;;  %v462_v48 = vld [vmem:[#allocation2 + $0x248] sm:$0xff]  ;;  %v461_v50 = vld [vmem:[#allocation2 + $0x240] sm:$0xff] }
  0x3c   : > { %360 = vmatprep.subr.mxu0 %v805_v0  ;;  %522 = vmatpush1.msra.mxu1 %v395_v51  ;;  %v429_v51 = vld [vmem:[#allocation2 + $0x140] sm:$0xff] }
  0x3d   : > { %361 = vmatpush2.msra.mxu0 %v287_v49  ;;  %523 = vmatprep.subr.mxu1 %v394_v53  ;;  %v430_v49 = vld [vmem:[#allocation2 + $0x148] sm:$0xff]  ;;  %v428_v53 = vld [vmem:[#allocation2 + $0x138] sm:$0xff] }
  0x3e   : > { %362 = vmatprep.subr.mxu0 %v805_v0  ;;  %524 = vmatpush1.msra.mxu1 %v393_v54  ;;  %v459_v54 = vld [vmem:[#allocation2 + $0x230] sm:$0xff] }
  0x3f   : > { %363 = vmatpush2.msra.mxu0 %v286_v52  ;;  %525 = vmatprep.subr.mxu1 %v392_v56  ;;  %v460_v52 = vld [vmem:[#allocation2 + $0x238] sm:$0xff]  ;;  %v458_v56 = vld [vmem:[#allocation2 + $0x228] sm:$0xff] }
  0x40   : > { %574 = vmatprep.subr.mxu0 %v484_v55  ;;  %526 = vmatpush1.msra.mxu1 %v391_v57  ;;  %v427_v55 = vld [vmem:[#allocation2 + $0x130] sm:$0xff]  ;;  %v426_v57 = vld [vmem:[#allocation2 + $0x128] sm:$0xff] }
  0x41   : > { %527 = vmatprep.subr.mxu1 %v390_v58  ;;  %v457_v58 = vld [vmem:[#allocation2 + $0x220] sm:$0xff] }
  0x42   : > { %528 = vmatpush1.msra.mxu1 %v389_v59  ;;  %v425_v59 = vld [vmem:[#allocation2 + $0x120] sm:$0xff] }
  0x43   : > { %529 = vmatprep.subr.mxu1 %v452_v60  ;;  %v456_v60 = vld [vmem:[#allocation2 + $0x218] sm:$0xff] }
  0x44   : > { %530 = vmatpush2.msra.mxu1 %v451_v61  ;;  %v424_v61 = vld [vmem:[#allocation2 + $0x118] sm:$0xff] }
  0x45   : > { %531 = vmatprep.subr.mxu1 %v450_v62  ;;  %v455_v62 = vld [vmem:[#allocation2 + $0x210] sm:$0xff] }
  0x46   : > { %532 = vmatpush2.msra.mxu1 %v449_v63  ;;  %v423_v63 = vld [vmem:[#allocation2 + $0x110] sm:$0xff] }
  0x47   : > { %533 = vmatprep.subr.mxu1 %v448_v3  ;;  %v454_v3 = vld [vmem:[#allocation2 + $0x208] sm:$0xff] }
  0x48   : > { %534 = vmatpush2.msra.mxu1 %v447_v4  ;;  %v422_v4 = vld [vmem:[#allocation2 + $0x108] sm:$0xff] }
  0x49   : > { %535 = vmatprep.subr.mxu1 %v446_v5  ;;  %v453_v5 = vld [vmem:[#allocation2 + $0x200] sm:$0xff] }
  0x4a   : > { %536 = vmatpush2.msra.mxu1 %v445_v6  ;;  %v421_v6 = vld [vmem:[#allocation2 + $0x100] sm:$0xff] }
  0x4b   : > { %537 = vmatprep.subr.mxu1 %v444_v7  ;;  %v733_v7 = vld [vmem:[%s971_s2] ss:$0 sm:$0xff] }
  0x4c   : > { %538 = vmatpush2.msra.mxu1 %v443_v8 }
  0x4d   : > { %539 = vmatprep.subr.mxu1 %v442_v9 }
  0x4e   : > { %540 = vmatpush2.msra.mxu1 %v441_v10 }
  0x4f   : > { %541 = vmatprep.subr.mxu1 %v440_v11 }
  0x50   : > { %542 = vmatpush2.msra.mxu1 %v439_v12 }
  0x51   : > { %543 = vmatprep.subr.mxu1 %v438_v13 }
  0x52   : > { %544 = vmatpush2.msra.mxu1 %v437_v14 }
  0x53   : > { %545 = vmatprep.subr.mxu1 %v436_v15 }
  0x54   : > { %546 = vmatpush2.msra.mxu1 %v435_v16 }
  0x55   : > { %547 = vmatprep.subr.mxu1 %v434_v17 }
  0x56   : > { %548 = vmatpush2.msra.mxu1 %v433_v43 }
  0x57   : > { %549 = vmatprep.subr.mxu1 %v432_v45 }
  0x58   : > { %550 = vmatpush2.msra.mxu1 %v431_v47 }
  0x59   : > { %551 = vmatprep.subr.mxu1 %v430_v49 }
  0x5a   : > { %552 = vmatpush2.msra.mxu1 %v429_v51 }
  0x5b   : > { %553 = vmatprep.subr.mxu1 %v428_v53 }
  0x5c   : > { %554 = vmatpush2.msra.mxu1 %v427_v55 }
  0x5d   : > { %555 = vmatprep.subr.mxu1 %v426_v57 }
  0x5e   : > { %556 = vmatpush2.msra.mxu1 %v425_v59 }
  0x5f   : > { %557 = vmatprep.subr.mxu1 %v424_v61 }
  0x60   : > { %558 = vmatpush2.msra.mxu1 %v423_v63 }
  0x61   : > { %559 = vmatprep.subr.mxu1 %v422_v4 }
  0x62   : > { %560 = vmatpush2.msra.mxu1 %v421_v6 }
  0x95   : > { %v251_v19 = vpop.permute.xlu1 %250 }
  0x96   : > { %v249_v18 = vpop.permute.xlu0 %248  ;;  %v266_v25 = vsel %vm264_vm2, %v869_v2, %v251_v19  ;;  %v475_v2 = vld [vmem:[#allocation2 + $0x2b0] sm:$0xff] }
  0x97   : > { %v265_v20 = vsel %vm264_vm2, %v867_v1, %v249_v18  ;;  %v478_v1 = vld [vmem:[#allocation2 + $0x2c8] sm:$0xff] }
  0x99   : > { %v261_v26 = vpop.permute.xlu1 %260 }
  0x9a   : > { %v259_v21 = vpop.permute.xlu0 %258  ;;  %v269_v30 = vsel %vm267_vm4, %v266_v25, %v261_v26  ;;  %v485_v25 = vld [vmem:[%s973_s4] sm:$0x3] }
  0x9b   : > { %734 = vmatprep.mubr.msk.f32.mxu0 %vm295_vm3, %v259_v21  ;;  %v268_v23 = vsel %vm267_vm4, %v265_v20, %v259_v21 }
  0x9c   : > { %365 = vmatmul.mubr.f32.vlgmr.msra.gmra.mxu0 %v268_v23 }
  0x9d   : > { %735 = vmatprep.mubr.msk.f32.mxu0 %vm295_vm3, %v261_v26  ;;  %575 = vmatpush1.msra.mxu0 %v483_v22  ;;  %v487_v22 = vlaneseq }
  0x9e   : > { %576 = vmatprep.subr.mxu0 %v482_v24 }
  0x9f   : > { %577 = vmatpush1.msra.mxu0 %v481_v27  ;;  %v488_v23 = vshrl.u32 %v487_v22, 7 }
  0xa0   : > { %370 = vmatmul.mubr.f32.gmra.mxu0 %v269_v30  ;;  %578 = vmatprep.subr.mxu0 %v480_v28 }
  0xa1   : > { %579 = vmatpush1.msra.mxu0 %v479_v29  ;;  %638 = vmatprep.mubr.f32.mxu0 %v805_v0  ;;  %v489_v24 = vsub.s32 0, %v488_v23  ;;  %v493_v26 = vsub.s32 1, %v488_v23 }
  0xa2   : > { %580 = vmatprep.subr.mxu0 %v478_v1 }
  0xa3   : > { %581 = vmatpush1.msra.mxu0 %v477_v31  ;;  %v490_v27 = vrot.slane %v485_v25, %v489_v24  ;;  %v494_v29 = vrot.slane %v485_v25, %v493_v26 }
  0xa4   : > { %582 = vmatprep.subr.mxu0 %v476_v32 }
  0xa5   : > { %583 = vmatpush1.msra.mxu0 %v475_v2 }
  0xa6   : > { %584 = vmatprep.subr.mxu0 %v474_v33 }
  0xa7   : > { %585 = vmatpush1.msra.mxu0 %v473_v34 }
  0xa8   : > { %586 = vmatprep.subr.mxu0 %v472_v35 }
  0xa9   : > { %587 = vmatpush1.msra.mxu0 %v471_v36 }
  0xaa   : > { %588 = vmatprep.subr.mxu0 %v470_v37 }
  0xab   : > { %589 = vmatpush1.msra.mxu0 %v469_v38 }
  0xac   : > { %590 = vmatprep.subr.mxu0 %v468_v39 }
  0xad   : > { %591 = vmatpush1.msra.mxu0 %v467_v40 }
  0xae   : > { %592 = vmatprep.subr.mxu0 %v466_v41 }
  0xaf   : > { %593 = vmatpush1.msra.mxu0 %v465_v42 }
  0xb0   : > { %594 = vmatprep.subr.mxu0 %v464_v44 }
  0xb1   : > { %595 = vmatpush1.msra.mxu0 %v463_v46 }
  0xb2   : > { %596 = vmatprep.subr.mxu0 %v462_v48 }
  0xb3   : > { %597 = vmatpush1.msra.mxu0 %v461_v50 }
  0xb4   : > { %598 = vmatprep.subr.mxu0 %v460_v52 }
  0xb5   : > { %599 = vmatpush1.msra.mxu0 %v459_v54 }
  0xb6   : > { %600 = vmatprep.subr.mxu0 %v458_v56 }
  0xb7   : > { %601 = vmatpush1.msra.mxu0 %v457_v58 }
  0xb8   : > { %602 = vmatprep.subr.mxu0 %v456_v60 }
  0xb9   : > { %603 = vmatpush1.msra.mxu0 %v455_v62 }
  0xba   : > { %604 = vmatprep.subr.mxu0 %v454_v3 }
  0xbb   : > { %605 = vmatpush1.msra.mxu0 %v453_v5 }
 0x15c   : > { %v366_v8 = vpop.f32.mrf.mxu0 }
 0x15d   : > { %v367_v9 = vadd.f32 %v733_v7, %v366_v8 }
 0x15e   : > { %v368_v10 = vpop.f32.mrf.mxu0 }
 0x15f   : > { %v375_v12 = vmax.f32 %v367_v9, 0.0 }
 0x160   : > { %v371_v11 = vpop.f32.mrf.mxu0 }
 0x161   : > { %v372_v13 = vadd.f32 %v733_v7, %v371_v11  ;;  %v384_v16 = vrot.slane %v375_v12, 2  ;;  %v379_v18 = vrot.slane %v375_v12, 1 }
 0x162   : > { %v373_v14 = vpop.f32.mrf.mxu0 }
 0x163   : > { %v376_v15 = vmax.f32 %v372_v13, 0.0 }
 0x165   : > { %v385_v17 = vrot.slane %v376_v15, 2  ;;  %v380_v19 = vrot.slane %v376_v15, 1 }
 0x167   : > { %v381_v20 = vsel %vm244_vm0, %v379_v18, %v380_v19  ;;  %v386_v21 = vsel %vm254_vm1, %v384_v16, %v385_v17 }
 0x168   : > { %561 = vmatprep.mubr.f32.mxu1 %v381_v20  ;;  %639 = vmatmul.mubr.f32.vlgmr.msra.gmra.mxu0 %v386_v21 }
 0x169   : > { %562 = vmatmul.mubr.f32.vlgmr.msra.gmra.mxu1 %v375_v12  ;;  %644 = vmatprep.mubr.f32.mxu0 %v805_v0 }
 0x16a   : > { %567 = vmatprep.mubr.f32.mxu1 %v380_v19 }
 0x16c   : > { %645 = vmatmul.mubr.f32.gmra.mxu0 %v385_v17 }
 0x16d   : > { %568 = vmatmul.mubr.f32.gmra.mxu1 %v376_v15 }
 0x228   : > { %v640_v28 = vpop.f32.mrf.mxu0 }
 0x229   : > { %v563_v30 = vpop.f32.mrf.mxu1 }
 0x22a   : > { %v564_v1 = vadd.f32 %v563_v30, %v490_v27  ;;  %v642_v31 = vpop.f32.mrf.mxu0 }
 0x22b   : > { %v565_v0 = vpop.f32.mrf.mxu1 }
 0x22c   : > { %v641_v32 = vadd.f32 %v640_v28, %v564_v1  ;;  %v566_v2 = vadd.f32 %v565_v0, %v494_v29  ;;  %v646_v33 = vpop.f32.mrf.mxu0 }
 0x22d   : > { %v569_v34 = vpop.f32.mrf.mxu1 }
 0x22e   : > { %651 = vst [vmem:[%s239_s6] sm:$0xff] %v641_v32  ;;  %v643_v35 = vadd.f32 %v642_v31, %v566_v2  ;;  %v570_v36 = vadd.f32 %v569_v34, %v490_v27  ;;  %v648_v40 = vpop.f32.mrf.mxu0 }
 0x22f   : > { %v571_v37 = vpop.f32.mrf.mxu1 }
 0x230   : > { %652 = vst [vmem:[%s239_s6 + $0x8] sm:$0xff] %v643_v35  ;;  %v647_v38 = vadd.f32 %v646_v33, %v570_v36  ;;  %v572_v39 = vadd.f32 %v571_v37, %v494_v29 }
 0x232   : > { %653 = vst [vmem:[%s239_s6 + $0x10] sm:$0xf] %v647_v38  ;;  %v649_v41 = vadd.f32 %v648_v40, %v572_v39 }
 0x234   : > { %654 = vst [vmem:[%s239_s6 + $0x18] sm:$0xf] %v649_v41 }
 0x235 PF: > { %s16_s18 = sadd.s32 1, %s800_s18  }
 0x236   : > { %p13_p1 = scmp.ge.s32.totalorder %s16_s18, 4  }
 0x238   :  { %15 = sbr.rel (!%p13_p1) target bundleno = 1 (0x1), region = 75 }
 0x23d   :  { %676 = vsyncpa [#allocation3], 1 }
 0x23e   :  { %678 = vsyncpa [#allocation3 + $0x1], 1 }

</bundles_post_ra>
